<compile_context>
chip_gen: v6e
topology: v6e:2x2x1
jax: 0.10.0
libtpu: 0.0.40
codegen_flags: <defaults>
</compile_context>

<pallas_src>
import jax
import jax.numpy as jnp
from jax.experimental import pallas as pl
from jax.experimental.pallas import tpu as pltpu


def _round_up(x, m):
    return (x + m - 1) // m * m


# ---------------------------------------------------------------------------
# Pallas kernel: the whole FullyConnectedBlock for one M tile
#   for l in layers: h = ReLU( (h @ W_l^T) * scale_l + shift_l )
#   out = h + x            (residual, f32)
# ---------------------------------------------------------------------------
def _fc_block_kernel(x_ref, w_ref, scale_ref, shift_ref, o_ref, h_ref):
    l = pl.program_id(1)
    num_l = pl.num_programs(1)

    # Layer 0: load the (VMEM-resident) input tile into the bf16 hidden-state
    # scratch — one cast per M tile, not per grid step.
    @pl.when(l == 0)
    def _():
        h_ref[...] = x_ref[...].astype(h_ref.dtype)

    # y = ReLU( (h @ W_l^T) * scale_l + shift_l ), bf16 MXU operands, f32 accumulate.
    y = jnp.dot(h_ref[...], w_ref[...], preferred_element_type=jnp.float32)
    y = jnp.maximum(y * scale_ref[...] + shift_ref[...], 0.0)

    # Not the last layer: keep the activation in VMEM (bf16) for the next layer —
    # no HBM write/read between layers.
    @pl.when(l < num_l - 1)
    def _():
        h_ref[...] = y.astype(h_ref.dtype)

    # Last layer: fuse the block residual (original input tile, still resident in
    # f32) and emit the block output once (lane-dense store, written back once per
    # M tile when the output block index changes).
    @pl.when(l == num_l - 1)
    def _():
        o_ref[...] = (y + x_ref[...].astype(jnp.float32)).astype(o_ref.dtype)


def fused_fc_block(x2d, w_t, scale, shift, *, tm=256):
    """Run the whole block. x2d:(M,D) f32, w_t:(L,Dp,Dp) bf16, scale/shift:(L,1,Dp) f32."""
    M, D = x2d.shape
    L, Dp, Dp2 = w_t.shape
    assert Dp == Dp2 and Dp % 128 == 0 and D <= Dp, (D, Dp, Dp2)

    tm = min(tm, _round_up(M, 8))
    Mp = _round_up(M, tm)

    xp = x2d
    if Mp != M or Dp != D:
        xp = jnp.pad(x2d, ((0, Mp - M), (0, Dp - D)))

    grid = (Mp // tm, L)

    # VMEM budget (BlockSpec inputs/outputs are double-buffered by the pipeline).
    est_vmem = (2 * tm * Dp * 4          # x (f32)
                + 2 * Dp * Dp * 2        # W_l^T (bf16)
                + 2 * 2 * Dp * 4         # scale + shift
                + 2 * tm * Dp * 4        # output (f32)
                + tm * Dp * 2)           # hidden-state scratch (bf16)
    vmem_limit = None
    if est_vmem > 14 * 1024 * 1024:
        vmem_limit = min(est_vmem + (4 << 20), 56 * 1024 * 1024)
    # TODO(synk): hidden dims whose (Dp, Dp) bf16 weight slab does not fit VMEM would
    # need an extra output-column tiling axis; not needed for typical dims (<= ~3k).

    out = pl.pallas_call(
        _fc_block_kernel,
        out_shape=jax.ShapeDtypeStruct((Mp, Dp), x2d.dtype),
        grid_spec=pltpu.PrefetchScalarGridSpec(
            num_scalar_prefetch=0,
            grid=grid,
            in_specs=[
                pl.BlockSpec((tm, Dp), lambda i, l: (i, 0)),            # x (resident per i)
                pl.BlockSpec((None, Dp, Dp), lambda i, l: (l, 0, 0)),   # W_l^T
                pl.BlockSpec((None, 1, Dp), lambda i, l: (l, 0, 0)),    # scale_l
                pl.BlockSpec((None, 1, Dp), lambda i, l: (l, 0, 0)),    # shift_l
            ],
            out_specs=pl.BlockSpec((tm, Dp), lambda i, l: (i, 0)),
            scratch_shapes=[pltpu.VMEM((tm, Dp), jnp.bfloat16)],
        ),
        compiler_params=pltpu.CompilerParams(
            dimension_semantics=("parallel", "arbitrary"),
            vmem_limit_bytes=vmem_limit),
        cost_estimate=pl.CostEstimate(
            flops=2 * Mp * Dp * Dp * L,
            transcendentals=0,
            bytes_accessed=int(Mp * Dp * 4                 # x read
                               + grid[0] * L * Dp * Dp * 2  # weights per M tile
                               + grid[0] * L * 2 * Dp * 4   # scale/shift
                               + Mp * Dp * 4)),             # output write
    )(xp, w_t, scale, shift)

    if Mp != M or Dp != D:
        out = out[:M, :D]
    return out


# ---------------------------------------------------------------------------
# Parameter folding — done ONCE, outside the per-forward path.
# Folds LinearWithClipping (+ eval-mode BatchNorm1d) of every layer, transposes,
# zero-pads to lane multiples and stacks the weights.
# ---------------------------------------------------------------------------
def fold_block_params(raw_layers, *, eps=1e-5, weight_max_norm=0.0,
                      use_batch_norm=True, weight_dtype=jnp.bfloat16):
    """raw_layers: list of (weight (N,D), bias, gamma, beta, running_mean, running_var)."""
    dim = raw_layers[0][0].shape[1]
    n_out = raw_layers[0][0].shape[0]
    assert dim == n_out, "residual block requires num_hidden_nodes == input_dim"
    Dp = _round_up(dim, 128)

    w_ts, scales, shifts = [], [], []
    for (weight, bias, gamma, beta, rmean, rvar) in raw_layers:
        w = weight.astype(jnp.float32)                     # (N, D), nn.Linear layout
        if weight_max_norm > 0.0:
            norm = jnp.sqrt(jnp.sum(w * w))
            clip = jnp.where(norm > weight_max_norm,
                             weight_max_norm / norm, jnp.float32(1.0))
        else:
            clip = jnp.float32(1.0)

        if use_batch_norm:
            a = gamma.astype(jnp.float32) * jax.lax.rsqrt(
                rvar.astype(jnp.float32) + eps)
            scale = a * clip
            shift = (a * (bias.astype(jnp.float32) - rmean.astype(jnp.float32))
                     + beta.astype(jnp.float32))
        else:
            scale = jnp.broadcast_to(clip, (n_out,)).astype(jnp.float32)
            shift = bias.astype(jnp.float32)

        w_t = jnp.pad(w.T, ((0, Dp - dim), (0, Dp - n_out))).astype(weight_dtype)
        w_ts.append(w_t)
        scales.append(jnp.pad(scale, (0, Dp - n_out)).reshape(1, Dp))
        shifts.append(jnp.pad(shift, (0, Dp - n_out)).reshape(1, Dp))

    return {
        "w_t": jnp.stack(w_ts),          # (L, Dp, Dp) bf16, pre-transposed + padded
        "scale": jnp.stack(scales),      # (L, 1, Dp) f32
        "shift": jnp.stack(shifts),      # (L, 1, Dp) f32
        "dim": dim,
    }


# ---------------------------------------------------------------------------
# FullyConnectedBlock forward (inference path)
# ---------------------------------------------------------------------------
def fully_connected_block_forward(folded, x, is_training=False):
    # TODO(synk): is_training=True with batch-stats BN / dropout_rate>0 not supported.
    orig_shape = x.shape
    h = x.reshape(-1, orig_shape[-1]) if x.ndim == 3 else x
    out = fused_fc_block(h, folded["w_t"], folded["scale"], folded["shift"])
    if x.ndim == 3:
        out = out.reshape(orig_shape[0], orig_shape[1], -1)
    return out


# ---------------------------------------------------------------------------
# Demo / self-test
# ---------------------------------------------------------------------------
if __name__ == "__main__":
    key = jax.random.PRNGKey(0)

    batch, seq, dim = 2, 8, 256          # residual requires num_hidden_nodes == dim
    num_fcs_per_block = 2
    weight_max_norm = 2.0                # exercise the clipping path
    eps = 1e-5

    keys = jax.random.split(key, 1 + 5 * num_fcs_per_block)
    x = jax.random.normal(keys[0], (batch, seq, dim), dtype=jnp.float32)

    raw_layers = []
    for i in range(num_fcs_per_block):
        kw, kg, kb, km, kv = keys[1 + 5 * i: 6 + 5 * i]
        std = jnp.sqrt(2.0 / dim)                                  # kaiming_normal_
        w = jax.random.normal(kw, (dim, dim), dtype=jnp.float32) * std
        b = jnp.zeros((dim,), dtype=jnp.float32)                   # zeros_ bias init
        gamma = 1.0 + 0.2 * jax.random.normal(kg, (dim,), dtype=jnp.float32)
        beta = 0.1 * jax.random.normal(kb, (dim,), dtype=jnp.float32)
        rmean = 0.1 * jax.random.normal(km, (dim,), dtype=jnp.float32)
        rvar = 1.0 + 0.2 * jax.random.uniform(kv, (dim,), dtype=jnp.float32)
        raw_layers.append((w, b, gamma, beta, rmean, rvar))

    folded = fold_block_params(raw_layers, eps=eps,
                               weight_max_norm=weight_max_norm,
                               weight_dtype=jnp.bfloat16)

    out = fully_connected_block_forward(folded, x)
    out = jax.block_until_ready(out)

    # --- Reference 1: identical folded bf16-weight math in plain JAX (tight check) ---
    def ref_folded(x):
        h = x.reshape(-1, dim)
        res = h
        a = h.astype(jnp.bfloat16)
        y = None
        for l in range(num_fcs_per_block):
            z = jnp.dot(a, folded["w_t"][l, :dim, :dim],
                        preferred_element_type=jnp.float32)
            y = jnp.maximum(z * folded["scale"][l, 0, :dim]
                            + folded["shift"][l, 0, :dim], 0.0)
            a = y.astype(jnp.bfloat16)
        return (y + res).reshape(batch, seq, dim)

    ref1 = ref_folded(x)
    assert out.shape == ref1.shape, (out.shape, ref1.shape)
    assert jnp.allclose(out, ref1, atol=2e-3, rtol=2e-3), \
        float(jnp.max(jnp.abs(out - ref1)))

    # --- Reference 2: full-f32 PyTorch-style math (loose semantics check) ---
    def ref_torch_math(x):
        h = x.reshape(-1, dim)
        residual = h
        for (w, b, gamma, beta, rmean, rvar) in raw_layers:
            norm = jnp.sqrt(jnp.sum(w * w))
            w_c = jnp.where(norm > weight_max_norm,
                            w * weight_max_norm / norm, w)
            z = jnp.dot(h, w_c.T, precision=jax.lax.Precision.HIGHEST) + b
            z = gamma * (z - rmean) / jnp.sqrt(rvar + eps) + beta
            h = jnp.maximum(z, 0.0)
        return (h + residual).reshape(batch, seq, dim)

    ref2 = ref_torch_math(x)
    assert jnp.allclose(out, ref2, atol=5e-2, rtol=5e-2), \
        float(jnp.max(jnp.abs(out - ref2)))

    print("KERNEL_OK")
</pallas_src>

<mosaic_0001>
module attributes {stable_mosaic.version = 11 : i64} {
  func.func @_fc_block_kernel(%arg0: i32, %arg1: i32, %arg2: memref<16x256xf32, #tpu.memory_space<vmem>>, %arg3: memref<1x256x256xbf16, #tpu.memory_space<vmem>>, %arg4: memref<1x1x256xf32, #tpu.memory_space<vmem>>, %arg5: memref<1x1x256xf32, #tpu.memory_space<vmem>>, %arg6: memref<16x256xf32, #tpu.memory_space<vmem>>, %arg7: memref<16x256xbf16, #tpu.memory_space<vmem>>) attributes {dimension_semantics = [#tpu.dimension_semantics<parallel>, #tpu.dimension_semantics<arbitrary>], iteration_bounds = array<i64: 1, 2>, scalar_prefetch = 0 : i64, scratch_operands = 1 : i64, tpu.core_type = #tpu.core_type<tc>, window_params = [{transform_indices = @transform_0, window_bounds = array<i64: 16, 256>}, {transform_indices = @transform_1, window_bounds = array<i64: 1, 256, 256>}, {transform_indices = @transform_2, window_bounds = array<i64: 1, 1, 256>}, {transform_indices = @transform_3, window_bounds = array<i64: 1, 1, 256>}, {transform_indices = @transform_4, window_bounds = array<i64: 16, 256>}]} {
    %c0_i32 = arith.constant 0 : i32
    %0 = arith.cmpi eq, %arg1, %c0_i32 : i32
    %1 = arith.extui %0 : i1 to i32
    %c0_i32_0 = arith.constant 0 : i32
    %2 = arith.cmpi ne, %1, %c0_i32_0 : i32
    scf.if %2 {
      %c0_15 = arith.constant 0 : index
      %c0_16 = arith.constant 0 : index
      %23 = vector.load %arg2[%c0_15, %c0_16] : memref<16x256xf32, #tpu.memory_space<vmem>>, vector<16x256xf32>
      %24 = arith.truncf %23 : vector<16x256xf32> to vector<16x256xbf16>
      %c0_17 = arith.constant 0 : index
      %c0_18 = arith.constant 0 : index
      %25 = vector.load %arg7[%c0_17, %c0_18] : memref<16x256xbf16, #tpu.memory_space<vmem>>, vector<16x256xbf16>
      tpu.vector_store %arg7[%c0_17, %c0_18], %24 {strides = array<i32>} : memref<16x256xbf16, #tpu.memory_space<vmem>>, vector<16x256xbf16>,
    } else {
    }
    %c0 = arith.constant 0 : index
    %c0_1 = arith.constant 0 : index
    %3 = vector.load %arg7[%c0, %c0_1] : memref<16x256xbf16, #tpu.memory_space<vmem>>, vector<16x256xbf16>
    %c0_2 = arith.constant 0 : index
    %c0_3 = arith.constant 0 : index
    %c0_4 = arith.constant 0 : index
    %4 = vector.load %arg3[%c0_2, %c0_3, %c0_4] : memref<1x256x256xbf16, #tpu.memory_space<vmem>>, vector<1x256x256xbf16>
    %5 = vector.shape_cast %4 : vector<1x256x256xbf16> to vector<256x256xbf16>
    %cst = arith.constant dense<0.000000e+00> : vector<16x256xf32>
    %6 = tpu.matmul %3, %5, %cst {dimension_numbers = #tpu.dot_dimension_numbers<[1], [0], [0], [1], [0, 0, 1, 1], [], []>} : vector<16x256xbf16>, vector<256x256xbf16>, vector<16x256xf32> -> vector<16x256xf32>
    %c0_5 = arith.constant 0 : index
    %c0_6 = arith.constant 0 : index
    %c0_7 = arith.constant 0 : index
    %7 = vector.load %arg4[%c0_5, %c0_6, %c0_7] : memref<1x1x256xf32, #tpu.memory_space<vmem>>, vector<1x1x256xf32>
    %8 = vector.shape_cast %7 : vector<1x1x256xf32> to vector<1x256xf32>
    %9 = vector.broadcast %8 : vector<1x256xf32> to vector<16x256xf32>
    %10 = arith.mulf %6, %9 : vector<16x256xf32>
    %c0_8 = arith.constant 0 : index
    %c0_9 = arith.constant 0 : index
    %c0_10 = arith.constant 0 : index
    %11 = vector.load %arg5[%c0_8, %c0_9, %c0_10] : memref<1x1x256xf32, #tpu.memory_space<vmem>>, vector<1x1x256xf32>
    %12 = vector.shape_cast %11 : vector<1x1x256xf32> to vector<1x256xf32>
    %13 = vector.broadcast %12 : vector<1x256xf32> to vector<16x256xf32>
    %14 = arith.addf %10, %13 : vector<16x256xf32>
    %cst_11 = arith.constant 0.000000e+00 : f32
    %15 = vector.broadcast %cst_11 : f32 to vector<16x256xf32>
    %16 = arith.maximumf %14, %15 : vector<16x256xf32>
    %c1_i32 = arith.constant 1 : i32
    %17 = arith.cmpi slt, %arg1, %c1_i32 : i32
    %18 = arith.extui %17 : i1 to i32
    %c0_i32_12 = arith.constant 0 : i32
    %19 = arith.cmpi ne, %18, %c0_i32_12 : i32
    scf.if %19 {
      %23 = arith.truncf %16 : vector<16x256xf32> to vector<16x256xbf16>
      %c0_15 = arith.constant 0 : index
      %c0_16 = arith.constant 0 : index
      %24 = vector.load %arg7[%c0_15, %c0_16] : memref<16x256xbf16, #tpu.memory_space<vmem>>, vector<16x256xbf16>
      tpu.vector_store %arg7[%c0_15, %c0_16], %23 {strides = array<i32>} : memref<16x256xbf16, #tpu.memory_space<vmem>>, vector<16x256xbf16>,
    } else {
    }
    %c1_i32_13 = arith.constant 1 : i32
    %20 = arith.cmpi eq, %arg1, %c1_i32_13 : i32
    %21 = arith.extui %20 : i1 to i32
    %c0_i32_14 = arith.constant 0 : i32
    %22 = arith.cmpi ne, %21, %c0_i32_14 : i32
    scf.if %22 {
      %c0_15 = arith.constant 0 : index
      %c0_16 = arith.constant 0 : index
      %23 = vector.load %arg2[%c0_15, %c0_16] : memref<16x256xf32, #tpu.memory_space<vmem>>, vector<16x256xf32>
      %24 = arith.addf %16, %23 : vector<16x256xf32>
      %c0_17 = arith.constant 0 : index
      %c0_18 = arith.constant 0 : index
      %25 = vector.load %arg6[%c0_17, %c0_18] : memref<16x256xf32, #tpu.memory_space<vmem>>, vector<16x256xf32>
      tpu.vector_store %arg6[%c0_17, %c0_18], %24 {strides = array<i32>} : memref<16x256xf32, #tpu.memory_space<vmem>>, vector<16x256xf32>,
    } else {
    }
    return
  }
  func.func @transform_0(%arg0: i32, %arg1: i32) -> (i32, i32) {
    %c0_i32 = arith.constant 0 : i32
    %c0_i32_0 = arith.constant 0 : i32
    return %arg0, %c0_i32 : i32, i32
  }
  func.func @transform_1(%arg0: i32, %arg1: i32) -> (i32, i32, i32) {
    %c0_i32 = arith.constant 0 : i32
    %c0_i32_0 = arith.constant 0 : i32
    %c0_i32_1 = arith.constant 0 : i32
    return %arg1, %c0_i32, %c0_i32_0 : i32, i32, i32
  }
  func.func @transform_2(%arg0: i32, %arg1: i32) -> (i32, i32, i32) {
    %c0_i32 = arith.constant 0 : i32
    %c0_i32_0 = arith.constant 0 : i32
    %c0_i32_1 = arith.constant 0 : i32
    return %arg1, %c0_i32, %c0_i32_0 : i32, i32, i32
  }
  func.func @transform_3(%arg0: i32, %arg1: i32) -> (i32, i32, i32) {
    %c0_i32 = arith.constant 0 : i32
    %c0_i32_0 = arith.constant 0 : i32
    %c0_i32_1 = arith.constant 0 : i32
    return %arg1, %c0_i32, %c0_i32_0 : i32, i32, i32
  }
  func.func @transform_4(%arg0: i32, %arg1: i32) -> (i32, i32) {
    %c0_i32 = arith.constant 0 : i32
    %c0_i32_0 = arith.constant 0 : i32
    return %arg0, %c0_i32 : i32, i32
  }
}

</mosaic_0001>

<bundles_post_ra>
// kernel: tpu_custom_call.1
= control target key start
LH: loop header
LB: loop body
LE: loop exit
PB: predicated region body
PF: predicated region fallthrough
CT: control target
= control target key end

     0   :  { %9 = vsyncpa [#allocation4], 0  ;;  %s1365_s0 = inlined_call_operand.hbm [shape: f32[16,256], index: 0, kind: input, shape index: {}]   ;;  %s1366_s1 = inlined_call_operand.hbm [shape: bf16[2,256,256], index: 1, kind: input, shape index: {}]   ;;  %s1367_s2 = inlined_call_operand.hbm [shape: f32[2,1,256], index: 2, kind: input, shape index: {}]   ;;  %s1368_s3 = inlined_call_operand.vmem [shape: f32[2,1,256], index: 3, kind: input, shape index: {}]   ;;  %s1369_s4 = inlined_call_operand.hbm [shape: f32[16,256], index: 4, kind: output, shape index: {}]  }
   0x1   :  { %10 = vsyncpa [#allocation7], 0 }
   0x2   :  { %12 = vsyncpa [#allocation7 + $0x1], 0 }
   0x3   :  { %13 = vsyncpa [#allocation5], 0  ;;  %s1160_s15 = smov 0   ;;  %s1162_s16 = smov 0  }
   0x4   :  { %s1164_s17 = smov 0   ;;  %s1166_s18 = smov 0  }
   0x5   :  { %s1168_s19 = smov 0   ;;  %s1170_s20 = smov 0  }
   0x6 LB: > { %s28_s21 = sadd.s32 1, %s1119_s19  ;;  %s64_s22 = sadd.s32 1, %s1111_s17  ;;  %s1123_s20 = sphi %s1170_s20, %s19_s20   ;;  %s1119_s19 = sphi %s1168_s19, %s1381_s19   ;;  %s1115_s18 = sphi %s1166_s18, %s1380_s18   ;;  %s1111_s17 = sphi %s1164_s17, %s1379_s17   ;;  %s1107_s16 = sphi %s1162_s16, %s1378_s16   ;;  %s1103_s15 = sphi %s1160_s15, %s1377_s15  }
   0x7   : > { %p29_p0 = scmp.ge.s32.totalorder %s28_s21, 2  ;;  %p71_p1 = scmp.ne.s32.totalorder %s1111_s17, %s1107_s16 }
   0x8   : > { %p72_p2 = scmp.eq.s32.totalorder %s1123_s20, 0  ;;  %p848_p4 = scmp.lt.s32.totalorder %s1123_s20, 2 }
   0x9   : > { %s1383_s21 = smov (%p29_p0, %s28_s21), 0  ;;  %s196_s24 = sand.u32 1, %s1123_s20  }
   0xa   : > { %p73_p3 = por %p72_p2, %p71_p1  ;;  %s61_s23 = ssub.s32 %s1119_s19, %s1383_s21 }
   0xb   : > { %p62_p5 = scmp.eq.s32.totalorder %s61_s23, 0  ;;  %s198_s25 = sand.u32 1, %s1111_s17  }
   0xc   : > { %s818_s26 = sshll.u32 %s1119_s19, 12  ;;  %s762_s28 = sshll.u32 %s198_s25, 8 }
   0xd   : > { %s1204_s27 = scalar_select %p62_p5, %s1111_s17, %s64_s22  }
   0xe   : > { %s206_s5 = scalar_lea.hbm %s1366_s1, %s818_s26  ;;  %p1211_p6 = pnand %p848_p4, %p73_p3 }
   0xf   : > { %s200_s7 = scalar_lea.vmem [#allocation6], %s762_s28  ;;  %s1215_s9 = scalar_lea.sflag [#allocation7], %s196_s24 }
  0x10   : > { %s207_s8 = sshll.u32 %s200_s7, 4  ;;  %p961_p7 = pneg %p1211_p6  ;;  %s208_s8 = int_to_ptr.vmem [resolvable:$true] %s207_s8 }
  0x11   : > { %s972_s10 = scalar_lea.vmem %s208_s8, 4096  ;;  %s1125_s11 = smov [#allocation6]  }
  0x12   : > { %p973_p8 = scmp.ne.s32.totalorder %s208_s8, %s972_s10  ;;  %s977_s12 = sshll.u32 %s1125_s11, 4  ;;  %s978_s12 = int_to_ptr.vmem [resolvable:$false] %s977_s12 }
  0x13   : > { %s979_s13 = scalar_lea.vmem %s978_s12, 8192  ;;  %p980_p11 = scmp.lt.s32.totalorder %s208_s8, %s978_s12 }
  0x14   : > { %p975_p9 = pnand %p973_p8, %p961_p7  ;;  %p981_p12 = scmp.lt.s32.totalorder %s979_s13, %s972_s10 }
  0x16   : > { %p976_p10 = pneg %p975_p9  ;;  %p982_p13 = por %p981_p12, %p980_p11 }
  0x18   : > { %p983_p0 = pnand %p982_p13, %p976_p10 }
  0x1a   : > { %986 = shalt.err (!%p983_p0)
}
  0x1b   : > { %s1126_s14 = smov 128   ;;  %s1127_s22 = smov 8  }
  0x1c   : > { %843 = dma.hbm_to_vmem [thread:$0]  (!%p1211_p6), %s206_s5, 4096, %s208_s8, %s1215_s9, %s1126_s14, %s1126_s14, %s1127_s22  }
  0x1d   : > { %s1226_s23 = sadd.s32 4294967295, %s1123_s20   ;;  %p77_p1 = scmp.ne.s32.totalorder %s1107_s16, %s1103_s15 }
  0x1e   : > { %p1370_p2 = scmp.eq.s32.totalorder %s1226_s23, 0  ;;  %p759_p3 = scmp.ge.s32.totalorder %s1123_s20, 1 }
  0x1f   : > { %p166_p4 = scmp.lt.s32.totalorder %s1123_s20, 3  ;;  %s1128_s28 = smov [#allocation3]  }
  0x20   : > { %p1235_p5 = por %p1370_p2, %p77_p1  ;;  %s182_s29 = sshll.u32 %s1128_s28, 4  ;;  %s183_s29 = int_to_ptr.vmem [resolvable:$true] %s182_s29 }
  0x21   : > { %p1239_p8 = pnand %p759_p3, %p166_p4  ;;  %s765_s15 = sshll.u32 %s198_s25, 1 }
  0x22   : > { %s819_s5 = sshll.u32 %s1119_s19, 5  ;;  %s221_s7 = scalar_lea.vmem [#allocation8], %s765_s15 }
  0x23   : > { %p836_p9 = pneg %p1239_p8  ;;  %s229_s8 = sshll.u32 %s221_s7, 4  ;;  %s230_s8 = int_to_ptr.vmem [resolvable:$true] %s229_s8 }
  0x24   : > { %s1257_s12 = scalar_lea.hbm %s1367_s2, %s819_s5  ;;  %s998_s13 = scalar_lea.vmem %s183_s29, 512 }
  0x25   : > { %p1249_p10 = pnand %p836_p9, %p1370_p2  ;;  %p999_p12 = scmp.ne.s32.totalorder %s183_s29, %s998_s13 }
  0x26   : > { %p1006_p1 = scmp.lt.s32.totalorder %s183_s29, %s183_s29  ;;  %p1007_p3 = scmp.lt.s32.totalorder %s998_s13, %s998_s13 }
  0x27   : > { %p989_p11 = pneg %p1249_p10 }
  0x28   : > { %p1008_p4 = por %p1007_p3, %p1006_p1 }
  0x29   : > { %p1001_p13 = pnand %p999_p12, %p989_p11 }
  0x2b   : > { %p1002_p0 = pneg %p1001_p13 }
  0x2d   : > { %p1009_p9 = pnand %p1008_p4, %p1002_p0 }
  0x2f   : > { %1012 = shalt.err (!%p1009_p9)
}
  0x30   : > { %s1129_s25 = smov 256   ;;  %s1130_s14 = smov 16  }
  0x31   : > { %839 = dma.hbm_to_vmem [thread:$0]  (!%p1249_p10), %s1365_s0, 512, %s183_s29, [#allocation4], %s1129_s25, %s1129_s25, %s1130_s14  }
  0x32   : > { %s1026_s15 = scalar_lea.vmem %s230_s8, 32  ;;  %s1131_s5 = smov [#allocation8]  }
  0x33   : > { %p1027_p2 = scmp.ne.s32.totalorder %s230_s8, %s1026_s15  ;;  %s1031_s7 = sshll.u32 %s1131_s5, 4  ;;  %s1032_s7 = int_to_ptr.vmem [resolvable:$false] %s1031_s7 }
  0x34   : > { %s1033_s10 = scalar_lea.vmem %s1032_s7, 64  ;;  %p1034_p13 = scmp.lt.s32.totalorder %s230_s8, %s1032_s7 }
  0x35   : > { %p1029_p11 = pnand %p1027_p2, %p961_p7  ;;  %p1035_p0 = scmp.lt.s32.totalorder %s1033_s10, %s1026_s15 }
  0x37   : > { %p1030_p12 = pneg %p1029_p11  ;;  %p1036_p1 = por %p1035_p0, %p1034_p13 }
  0x39   : > { %p1037_p3 = pnand %p1036_p1, %p1030_p12 }
  0x3b   : > { %1040 = shalt.err (!%p1037_p3)
}
  0x3c   : > { %846 = dma.hbm_to_vmem [thread:$0]  (!%p1211_p6), %s1257_s12, 32, %s230_s8, %s1215_s9  }
  0x3d   : > { %245 = sbr.rel (%p1239_p8) target bundleno = 385 (0x181), region = 36  ;;  %p1375_p7 = scmp.eq.s32.totalorder (!%p1239_p8), %s1226_s23, 0 }
  0x42   : > { %1090 = dma.done.wait (%p1375_p7), [#allocation4], 512   ;;  %p1376_p2 = pmov %p1375_p7 }
  0x43   : > { %s251_s29 = sand.u32 1, %s1226_s23   ;;  %s253_s30 = sand.u32 1, %s1107_s16  }
  0x44   : > { %1092 = vsyncadd (%p1376_p2), [#allocation4], 4294966784  ;;  %s770_s11 = sshll.u32 %s253_s30, 8  ;;  %s252_s13 = scalar_lea.sflag [#allocation7], %s251_s29 }
  0x45   : > { %s1281_s6 = scalar_lea.vmem [#allocation6], %s770_s11 }
  0x46   : > { %1094 = dma.done.wait (%p1235_p5), %s252_s13, 4128  }
  0x47   : > { %1096 = vsyncadd (%p1235_p5), %s252_s13, 4294963168  ;;  %s1287_s9 = sshll.u32 %s253_s30, 1  ;;  %p294_p6 = scmp.lt.s32.totalorder %s1115_s18, 1 }
  0x48   : > { %s264_s22 = scalar_lea.vmem [#allocation8], %s1287_s9  ;;  %p773_p8 = scmp.ne.s32.totalorder %s1115_s18, 0 }
  0x49   : > { %s295_s26 = scalar_select %p294_p6, %s1115_s18, 1 }
  0x4a   : > { %302 = sbr.rel (%p773_p8) target bundleno = 84 (0x54), region = 52 }
  0x4b   : > { %s772_s8 = sshll.u32 %s295_s26, 1 }
  0x4c   : > { %s1294_s14 = scalar_lea.vmem %s1368_s3, %s772_s8 }
  0x4f   : > { %v303_v0 = vld [vmem:[#allocation3] sm:$0xff]  ;;  %v304_v1 = vld [vmem:[#allocation3 + $0x8] sm:$0xff]  ;;  %v305_v2 = vld [vmem:[#allocation3 + $0x10] sm:$0xff] }
  0x50   : > { %v820_v3 = vpack.c.bf16 %v304_v1, %v303_v0  ;;  %v306_v4 = vld [vmem:[#allocation3 + $0x18] sm:$0xff] }
  0x51   : > { %v821_v5 = vpack.c.bf16 %v306_v4, %v305_v2 }
  0x52   : > { %319 = vst [vmem:[#allocation2] sm:$0xff] %v820_v3 }
  0x53   : > { %320 = vst [vmem:[#allocation2 + $0x8] sm:$0xff] %v821_v5 }
  0x54 PF: > { %v908_v6 = vld [vmem:[%s1281_s6 + $0x74] ss:$8 sps:$4 sm:$0xff]   ;;  %v910_v7 = vld [vmem:[%s1281_s6 + $0x70] ss:$8 sps:$4 sm:$0xff]   ;;  %v911_v8 = vld [vmem:[%s1281_s6 + $0x64] ss:$8 sps:$4 sm:$0xff]   ;;  %v570_v40 = vlaneseq }
  0x55   : > { %525 = vmatprep.subr.bf16.mxu0 %v908_v6  ;;  %v913_v9 = vld [vmem:[%s1281_s6 + $0x60] ss:$8 sps:$4 sm:$0xff]   ;;  %v914_v10 = vld [vmem:[%s1281_s6 + $0x54] ss:$8 sps:$4 sm:$0xff]   ;;  %v916_v11 = vld [vmem:[%s1281_s6 + $0x50] ss:$8 sps:$4 sm:$0xff]  }
  0x56   : > { %526 = vmatpush1.bf16.msra.mxu0 %v910_v7  ;;  %v917_v12 = vld [vmem:[%s1281_s6 + $0x44] ss:$8 sps:$4 sm:$0xff]   ;;  %v919_v13 = vld [vmem:[%s1281_s6 + $0x40] ss:$8 sps:$4 sm:$0xff]   ;;  %v920_v14 = vld [vmem:[%s1281_s6 + $0x34] ss:$8 sps:$4 sm:$0xff]  }
  0x57   : > { %527 = vmatprep.subr.bf16.mxu0 %v911_v8  ;;  %v922_v15 = vld [vmem:[%s1281_s6 + $0x30] ss:$8 sps:$4 sm:$0xff]   ;;  %v923_v16 = vld [vmem:[%s1281_s6 + $0x24] ss:$8 sps:$4 sm:$0xff]   ;;  %v925_v17 = vld [vmem:[%s1281_s6 + $0x20] ss:$8 sps:$4 sm:$0xff]  }
  0x58   : > { %v926_v18 = vld [vmem:[%s1281_s6 + $0x14] ss:$8 sps:$4 sm:$0xff]   ;;  %v928_v20 = vld [vmem:[%s1281_s6 + $0x10] ss:$8 sps:$4 sm:$0xff]   ;;  %v929_v21 = vld [vmem:[%s1281_s6 + $0x4] ss:$8 sps:$4 sm:$0xff]  }
  0x59   : > { %v931_v22 = vld [vmem:[%s1281_s6] ss:$8 sps:$4 sm:$0xff]   ;;  %v932_v23 = vld [vmem:[%s1281_s6 + $0xf4] ss:$8 sps:$4 sm:$0xff]   ;;  %v934_v24 = vld [vmem:[%s1281_s6 + $0xf0] ss:$8 sps:$4 sm:$0xff]  }
  0x5a   : > { %528 = vmatpush1.bf16.msra.mxu0 %v913_v9  ;;  %v958_v19 = vld [vmem:[#allocation2 + $0x4] ss:$8 sps:$4 sm:$0xff]   ;;  %v935_v25 = vld [vmem:[%s1281_s6 + $0xe4] ss:$8 sps:$4 sm:$0xff]   ;;  %v937_v26 = vld [vmem:[%s1281_s6 + $0xe0] ss:$8 sps:$4 sm:$0xff]  }
  0x5b   : > { %529 = vmatprep.subr.bf16.mxu0 %v914_v10  ;;  %557 = vmatprep.mubr.bf16.mxu0 %v958_v19  ;;  %v938_v27 = vld [vmem:[%s1281_s6 + $0xd4] ss:$8 sps:$4 sm:$0xff]   ;;  %v940_v28 = vld [vmem:[%s1281_s6 + $0xd0] ss:$8 sps:$4 sm:$0xff]   ;;  %v941_v29 = vld [vmem:[%s1281_s6 + $0xc4] ss:$8 sps:$4 sm:$0xff]  }
  0x5c   : > { %v943_v30 = vld [vmem:[%s1281_s6 + $0xc0] ss:$8 sps:$4 sm:$0xff]   ;;  %v944_v31 = vld [vmem:[%s1281_s6 + $0xb4] ss:$8 sps:$4 sm:$0xff]   ;;  %v946_v32 = vld [vmem:[%s1281_s6 + $0xb0] ss:$8 sps:$4 sm:$0xff]  }
  0x5d   : > { %v947_v33 = vld [vmem:[%s1281_s6 + $0xa4] ss:$8 sps:$4 sm:$0xff]   ;;  %v949_v34 = vld [vmem:[%s1281_s6 + $0xa0] ss:$8 sps:$4 sm:$0xff]   ;;  %v950_v35 = vld [vmem:[%s1281_s6 + $0x94] ss:$8 sps:$4 sm:$0xff]  }
  0x5e   : > { %530 = vmatpush1.bf16.msra.mxu0 %v916_v11  ;;  %v952_v36 = vld [vmem:[%s1281_s6 + $0x90] ss:$8 sps:$4 sm:$0xff]   ;;  %v953_v37 = vld [vmem:[%s1281_s6 + $0x84] ss:$8 sps:$4 sm:$0xff]   ;;  %v955_v38 = vld [vmem:[%s1281_s6 + $0x80] ss:$8 sps:$4 sm:$0xff]  }
  0x5f   : > { %531 = vmatprep.subr.bf16.mxu0 %v917_v12  ;;  %v956_v39 = vld [vmem:[#allocation2] ss:$8 sps:$4 sm:$0xff]   ;;  %v571_v41 = vshrl.u32 %v570_v40, 7  ;;  %v568_v43 = vld [vmem:[%s264_s22] sm:$0x3]  ;;  %p810_p5 = scmp.ge.s32.totalorder %s1115_s18, 1 }
  0x60   : > { %v584_v45 = vld [vmem:[%s1294_s14] sm:$0x3] }
  0x61   : > { %v572_v42 = vsub.s32 0, %v571_v41  ;;  %v576_v44 = vsub.s32 1, %v571_v41 }
  0x62   : > { %532 = vmatpush1.bf16.msra.mxu0 %v919_v13 }
  0x63   : > { %533 = vmatprep.subr.bf16.mxu0 %v920_v14  ;;  %v573_v46 = vrot.slane %v568_v43, %v572_v42  ;;  %v589_v47 = vrot.slane %v584_v45, %v572_v42  ;;  %v577_v48 = vrot.slane %v568_v43, %v576_v44  ;;  %v593_v51 = vrot.slane %v584_v45, %v576_v44 }
  0x66   : > { %534 = vmatpush1.bf16.msra.mxu0 %v922_v15 }
  0x67   : > { %535 = vmatprep.subr.bf16.mxu0 %v923_v16 }
  0x6a   : > { %536 = vmatpush1.bf16.msra.mxu0 %v925_v17 }
  0x6b   : > { %537 = vmatprep.subr.bf16.mxu0 %v926_v18 }
  0x6e   : > { %538 = vmatpush1.bf16.msra.mxu0 %v928_v20 }
  0x6f   : > { %539 = vmatprep.subr.bf16.mxu0 %v929_v21 }
  0x72   : > { %540 = vmatpush1.bf16.msra.mxu0 %v931_v22 }
  0x73   : > { %541 = vmatprep.subr.bf16.mxu0 %v932_v23 }
  0x76   : > { %542 = vmatpush2.bf16.msra.mxu0 %v934_v24 }
  0x77   : > { %543 = vmatprep.subr.bf16.mxu0 %v935_v25 }
  0x7a   : > { %544 = vmatpush2.bf16.msra.mxu0 %v937_v26 }
  0x7b   : > { %545 = vmatprep.subr.bf16.mxu0 %v938_v27 }
  0x7e   : > { %546 = vmatpush2.bf16.msra.mxu0 %v940_v28 }
  0x7f   : > { %547 = vmatprep.subr.bf16.mxu0 %v941_v29 }
  0x82   : > { %548 = vmatpush2.bf16.msra.mxu0 %v943_v30 }
  0x83   : > { %549 = vmatprep.subr.bf16.mxu0 %v944_v31 }
  0x86   : > { %550 = vmatpush2.bf16.msra.mxu0 %v946_v32 }
  0x87   : > { %551 = vmatprep.subr.bf16.mxu0 %v947_v33 }
  0x8a   : > { %552 = vmatpush2.bf16.msra.mxu0 %v949_v34 }
  0x8b   : > { %553 = vmatprep.subr.bf16.mxu0 %v950_v35 }
  0x8e   : > { %554 = vmatpush2.bf16.msra.mxu0 %v952_v36 }
  0x8f   : > { %555 = vmatprep.subr.bf16.mxu0 %v953_v37 }
  0x92   : > { %556 = vmatpush2.bf16.msra.mxu0 %v955_v38 }
  0x95   : > { %558 = vmatmul.mubr.bf16.vlgmr.msra.gmra.mxu0 %v956_v39 }
 0x155   : > { %v559_v49 = vpop.f32.mrf.mxu0 }
 0x156   : > { %v580_v50 = vmul.f32 %v573_v46, %v559_v49 }
 0x157   : > { %v561_v52 = vpop.f32.mrf.mxu0 }
 0x158   : > { %v596_v53 = vadd.f32 %v589_v47, %v580_v50  ;;  %v581_v54 = vmul.f32 %v577_v48, %v561_v52 }
 0x159   : > { %v563_v55 = vpop.f32.mrf.mxu0 }
 0x15a   : > { %v600_v56 = vmax.f32 %v596_v53, 0.0  ;;  %v597_v57 = vadd.f32 %v593_v51, %v581_v54  ;;  %v582_v58 = vmul.f32 %v573_v46, %v563_v55 }
 0x15b   : > { %v565_v59 = vpop.f32.mrf.mxu0 }
 0x15c   : > { %v601_v60 = vmax.f32 %v597_v57, 0.0  ;;  %v598_v61 = vadd.f32 %v589_v47, %v582_v58  ;;  %v583_v62 = vmul.f32 %v577_v48, %v565_v59  ;;  %607 = sbr.rel (%p810_p5) target bundleno = 357 (0x165), region = 56 }
 0x15e   : > { %v602_v63 = vmax.f32 %v598_v61, 0.0  ;;  %v599_v0 = vadd.f32 %v593_v51, %v583_v62 }
 0x160   : > { %v603_v1 = vmax.f32 %v599_v0, 0.0 }
 0x161   : > { %v822_v2 = vpack.c.bf16 %v601_v60, %v600_v56 }
 0x162   : > { %v823_v3 = vpack.c.bf16 %v603_v1, %v602_v63 }
 0x163   : > { %620 = vst [vmem:[#allocation2] sm:$0xff] %v822_v2 }
 0x164   : > { %621 = vst [vmem:[#allocation2 + $0x8] sm:$0xff] %v823_v3 }
 0x165 PF: > { %p813_p10 = scmp.ne.s32.totalorder %s1115_s18, 1 }
 0x167   : > { %625 = sbr.rel (%p813_p10) target bundleno = 369 (0x171), region = 60 }
 0x16c   : > { %v626_v4 = vld [vmem:[#allocation3] sm:$0xff]  ;;  %v627_v5 = vld [vmem:[#allocation3 + $0x8] sm:$0xff]  ;;  %v628_v6 = vld [vmem:[#allocation3 + $0x10] sm:$0xff] }
 0x16d   : > { %v630_v7 = vadd.f32 %v626_v4, %v600_v56  ;;  %v631_v8 = vadd.f32 %v627_v5, %v601_v60  ;;  %v632_v9 = vadd.f32 %v628_v6, %v602_v63  ;;  %v629_v10 = vld [vmem:[#allocation3 + $0x18] sm:$0xff] }
 0x16e   : > { %v633_v11 = vadd.f32 %v629_v10, %v603_v1 }
 0x16f   : > { %634 = vst [vmem:[#allocation9] sm:$0xff] %v630_v7  ;;  %635 = vst [vmem:[#allocation9 + $0x8] sm:$0xff] %v631_v8 }
 0x170   : > { %636 = vst [vmem:[#allocation9 + $0x10] sm:$0xff] %v632_v9  ;;  %637 = vst [vmem:[#allocation9 + $0x18] sm:$0xff] %v633_v11 }
 0x171 PF: > { %p850_p4 = scmp.eq.s32.totalorder %s1226_s23, 1  ;;  %s1132_s24 = smov [#allocation9]  }
 0x172   : > { %s648_s28 = sshll.u32 %s1132_s24, 4  ;;  %s649_s28 = int_to_ptr.vmem [resolvable:$true] %s648_s28 }
 0x173   : > { %s1041_s18 = scalar_lea.vmem %s649_s28, 512  ;;  %p1048_p13 = scmp.lt.s32.totalorder %s649_s28, %s649_s28 }
 0x174   : > { %p1042_p9 = scmp.ne.s32.totalorder %s649_s28, %s1041_s18  ;;  %p1049_p0 = scmp.lt.s32.totalorder %s1041_s18, %s1041_s18 }
 0x176   : > { %p1043_p11 = pnand %p1042_p9, %p850_p4  ;;  %p1050_p1 = por %p1049_p0, %p1048_p13 }
 0x178   : > { %p1044_p12 = pneg %p1043_p11 }
 0x17a   : > { %p1051_p3 = pnand %p1050_p1, %p1044_p12 }
 0x17c   : > { %1054 = shalt.err (!%p1051_p3)
}
 0x17d   : > { %s1133_s15 = smov 256   ;;  %s1134_s5 = smov 16  }
 0x17e   : > { %833 = dma.vmem_to_hbm [thread:$0]  (%p850_p4), %s649_s28, 512, %s1369_s4, [#allocation5], %s1133_s15, %s1133_s15, %s1134_s5  }
 0x17f   : > { %1098 = dma.done.wait (%p850_p4), [#allocation5], 512  }
 0x180   : > { %1100 = vsyncadd (%p850_p4), [#allocation5], 4294966784 }
 0x181 PF: > { %s19_s20 = sadd.s32 1, %s1123_s20   ;;  %s1377_s15 = smov %s1107_s16 }
 0x182   : > { %p16_p7 = scmp.ge.s32.totalorder %s19_s20, 4   ;;  %s1378_s16 = smov %s1111_s17 }
 0x183   : > { %s1379_s17 = smov %s1204_s27  ;;  %s1380_s18 = smov %s1119_s19 }
 0x184   : > { %s1381_s19 = smov %s1383_s21  ;;  %18 = sbr.rel (!%p16_p7) target bundleno = 6 (0x6), region = 106 }
 0x189   :  { %664 = vsyncpa [#allocation4], 1 }
 0x18a   :  { %666 = vsyncpa [#allocation4 + $0x1], 1 }
 0x18b   :  { %667 = vsyncpa [#allocation7], 1 }
 0x18c   :  { %669 = vsyncpa [#allocation7 + $0x1], 1 }
 0x18d   :  { %670 = vsyncpa [#allocation5], 1 }
 0x18e   :  { %672 = vsyncpa [#allocation5 + $0x1], 1 }

</bundles_post_ra>
